<compile_context>
chip_gen: v6e
topology: v6e:2x2x1
jax: 0.10.0
libtpu: 0.0.40
codegen_flags: <defaults>
</compile_context>

<pallas_src>
import jax
import jax.numpy as jnp
from jax.experimental import pallas as pl
from jax.experimental.pallas import tpu as pltpu
import numpy as np


def _ceil_to(x, m):
    return (x + m - 1) // m * m


def rnn_kernel(x_ref, h0_ref, wih_ref, whh_ref, bh_ref, wl_ref, bl_ref,
               y_ref, hT_ref):
    # Static shapes from the refs (all padded: Bp multiple of 8, Hp/Vp multiples of 128).
    Bp, Hp = h0_ref.shape
    TB = x_ref.shape[0]
    T = TB // Bp

    # ---- Hoisted input projection: one bf16 MXU op over all timesteps. --------
    #   Z = X @ W_ih^T + (b_ih + b_hh)            shape (T*Bp, Hp), f32 accumulate
    z = (jnp.dot(x_ref[...], wih_ref[...], preferred_element_type=jnp.float32)
         + bh_ref[...])

    whh = whh_ref[...]                             # (Hp, Hp) f32, stays in vregs/VMEM
    h = h0_ref[...]                                # (Bp, Hp) f32

    # ---- Serial recurrence (fully unrolled; strictly f32 on the critical path). ---
    # Per-step hidden states are kept in vregs (no VMEM scratch round-trip).
    hs = []
    for t in range(T):
        h = jnp.tanh(z[t * Bp:(t + 1) * Bp, :]     # full-tile static slice (Bp=8 rows)
                     + jnp.dot(h, whh, preferred_element_type=jnp.float32))
        hs.append(h)
    hs_all = jnp.concatenate(hs, axis=0)           # (T*Bp, Hp), tile-aligned pieces

    # ---- Hoisted output projection: one bf16 MXU op over all timesteps. -------
    #   Y = H_all @ W_lin^T + b_lin               shape (T*Bp, Vp), lane-dense store
    y_ref[...] = (jnp.dot(hs_all.astype(jnp.bfloat16), wl_ref[...],
                          preferred_element_type=jnp.float32)
                  + bl_ref[...]).astype(y_ref.dtype)

    # Final hidden state, written exactly once (full (8,128)-tile store).
    hT_ref[...] = h.astype(hT_ref.dtype)


def my_rnn_forward(X, h0, params):
    """X: (T, B, V) float32 (one-hot); h0: (B, H) float32 -> (Y (T,B,V), h_final (B,H))."""
    T, B, V = X.shape
    H = h0.shape[-1]

    # Padded sizes: sublane tile (8) for batch, lane tile (128) for feature dims.
    Bp = _ceil_to(B, 8)
    Hp = _ceil_to(H, 128)
    Vp = _ceil_to(V, 128)

    # Glue (XLA side, done once): transpose weights for row-major matmuls, fuse the
    # two recurrence biases, zero-pad everything to lane/sublane tiles, and cast the
    # two big (off-critical-path) projection operands to bf16.
    wih_t = jnp.pad(params["w_ih"].T, ((0, Vp - V), (0, Hp - H))).astype(jnp.bfloat16)
    whh_t = jnp.pad(params["w_hh"].T, ((0, Hp - H), (0, Hp - H)))               # f32
    b_h = jnp.pad(params["b_ih"] + params["b_hh"], (0, Hp - H)).reshape(1, Hp)  # f32
    wl_t = jnp.pad(params["w_lin"].T, ((0, Hp - H), (0, Vp - V))).astype(jnp.bfloat16)
    b_l = jnp.pad(params["b_lin"], (0, Vp - V)).reshape(1, Vp)                  # f32

    x2d = jnp.pad(X, ((0, 0), (0, Bp - B), (0, Vp - V))) \
             .reshape(T * Bp, Vp).astype(jnp.bfloat16)        # one-hot: bf16 is exact
    h0_pad = jnp.pad(h0, ((0, Bp - B), (0, Hp - H)))

    vmem = pl.BlockSpec(memory_space=pltpu.MemorySpace.VMEM)

    # Advisory cost hint so XLA schedules surrounding ops around this tiny call.
    flops = 2 * T * Bp * (Vp * Hp + Hp * Hp + Hp * Vp)
    bytes_accessed = (x2d.size * 2 + h0_pad.size * 4 + wih_t.size * 2
                      + whh_t.size * 4 + b_h.size * 4 + wl_t.size * 2 + b_l.size * 4
                      + T * Bp * Vp * 4 + Bp * Hp * 4)
    cost = pl.CostEstimate(flops=flops, transcendentals=T * Bp * Hp,
                           bytes_accessed=bytes_accessed)

    y2d, h_pad = pl.pallas_call(
        rnn_kernel,
        out_shape=(
            jax.ShapeDtypeStruct((T * Bp, Vp), jnp.float32),
            jax.ShapeDtypeStruct((Bp, Hp), jnp.float32),
        ),
        in_specs=[vmem] * 7,
        out_specs=(vmem, vmem),
        cost_estimate=cost,
    )(x2d, h0_pad, wih_t, whh_t, b_h, wl_t, b_l)

    # Slice the padding back off (padded batch rows / feature lanes are inert).
    y = y2d.reshape(T, Bp, Vp)[:, :B, :V]
    h_final = h_pad[:B, :H]
    return y, h_final


def reference_forward(X, h0, params):
    """Pure-JAX f32 reference matching torch.nn.RNN(tanh) + Linear."""
    def step(h, x_t):
        h = jnp.tanh(x_t @ params["w_ih"].T + params["b_ih"]
                     + h @ params["w_hh"].T + params["b_hh"])
        return h, h
    h_final, hs = jax.lax.scan(step, h0, X)
    y = hs @ params["w_lin"].T + params["b_lin"]
    return y, h_final


if __name__ == "__main__":
    # Small, deterministic shapes consistent with the module:
    # hidden = 50 (fixed by Linear(50, vocab_size)), vocab_size = 32.
    T, B, V, H = 8, 4, 32, 50

    key = jax.random.PRNGKey(0)
    ks = jax.random.split(key, 8)

    bound = 1.0 / np.sqrt(H)
    params = {
        "w_ih":  jax.random.uniform(ks[0], (H, V), jnp.float32, -bound, bound),
        "w_hh":  jax.random.uniform(ks[1], (H, H), jnp.float32, -bound, bound),
        "b_ih":  jax.random.uniform(ks[2], (H,),   jnp.float32, -bound, bound),
        "b_hh":  jax.random.uniform(ks[3], (H,),   jnp.float32, -bound, bound),
        "w_lin": jax.random.uniform(ks[4], (V, H), jnp.float32, -bound, bound),
        "b_lin": jax.random.uniform(ks[5], (V,),   jnp.float32, -bound, bound),
    }

    # One-hot real-valued inputs (torch feeds one-hot floats to nn.RNN here).
    tokens = jax.random.randint(ks[6], (T, B), 0, V)
    X = jax.nn.one_hot(tokens, V, dtype=jnp.float32)          # (T, B, V)
    h0 = jax.random.normal(ks[7], (B, H), jnp.float32) * 0.1  # squeezed (1,B,H)

    y, h_final = my_rnn_forward(X, h0, params)
    y = jax.block_until_ready(y)
    h_final = jax.block_until_ready(h_final)

    y_ref, h_ref = reference_forward(X, h0, params)
    # Tolerances loosened (vs 1e-5 f32) because the two hoisted projections use
    # bf16 MXU operands (f32 accumulation); the recurrence itself stays f32.
    np.testing.assert_allclose(np.asarray(y), np.asarray(y_ref), rtol=2e-2, atol=2e-2)
    np.testing.assert_allclose(np.asarray(h_final), np.asarray(h_ref), rtol=2e-2, atol=2e-2)

    print("KERNEL_OK")
</pallas_src>

<mosaic_0001>
module attributes {stable_mosaic.version = 11 : i64} {
  func.func @rnn_kernel(%arg0: memref<64x128xbf16, #tpu.memory_space<vmem>>, %arg1: memref<8x128xf32, #tpu.memory_space<vmem>>, %arg2: memref<128x128xbf16, #tpu.memory_space<vmem>>, %arg3: memref<128x128xf32, #tpu.memory_space<vmem>>, %arg4: memref<1x128xf32, #tpu.memory_space<vmem>>, %arg5: memref<128x128xbf16, #tpu.memory_space<vmem>>, %arg6: memref<1x128xf32, #tpu.memory_space<vmem>>, %arg7: memref<64x128xf32, #tpu.memory_space<vmem>>, %arg8: memref<8x128xf32, #tpu.memory_space<vmem>>) attributes {dimension_semantics = [], scalar_prefetch = 0 : i64, scratch_operands = 0 : i64, tpu.core_type = #tpu.core_type<tc>} {
    %c0 = arith.constant 0 : index
    %c0_0 = arith.constant 0 : index
    %0 = vector.load %arg0[%c0, %c0_0] : memref<64x128xbf16, #tpu.memory_space<vmem>>, vector<64x128xbf16>
    %c0_1 = arith.constant 0 : index
    %c0_2 = arith.constant 0 : index
    %1 = vector.load %arg2[%c0_1, %c0_2] : memref<128x128xbf16, #tpu.memory_space<vmem>>, vector<128x128xbf16>
    %cst = arith.constant dense<0.000000e+00> : vector<64x128xf32>
    %2 = tpu.matmul %0, %1, %cst {dimension_numbers = #tpu.dot_dimension_numbers<[1], [0], [0], [1], [0, 0, 1, 1], [], []>} : vector<64x128xbf16>, vector<128x128xbf16>, vector<64x128xf32> -> vector<64x128xf32>
    %c0_3 = arith.constant 0 : index
    %c0_4 = arith.constant 0 : index
    %3 = vector.load %arg4[%c0_3, %c0_4] : memref<1x128xf32, #tpu.memory_space<vmem>>, vector<1x128xf32>
    %4 = vector.broadcast %3 : vector<1x128xf32> to vector<64x128xf32>
    %5 = arith.addf %2, %4 : vector<64x128xf32>
    %c0_5 = arith.constant 0 : index
    %c0_6 = arith.constant 0 : index
    %6 = vector.load %arg3[%c0_5, %c0_6] : memref<128x128xf32, #tpu.memory_space<vmem>>, vector<128x128xf32>
    %c0_7 = arith.constant 0 : index
    %c0_8 = arith.constant 0 : index
    %7 = vector.load %arg1[%c0_7, %c0_8] : memref<8x128xf32, #tpu.memory_space<vmem>>, vector<8x128xf32>
    %8 = vector.extract_strided_slice %5 {offsets = [0, 0], sizes = [8, 128], strides = [1, 1]} : vector<64x128xf32> to vector<8x128xf32>
    %cst_9 = arith.constant dense<0.000000e+00> : vector<8x128xf32>
    %9 = tpu.matmul %7, %6, %cst_9 {dimension_numbers = #tpu.dot_dimension_numbers<[1], [0], [0], [1], [0, 0, 1, 1], [], []>} : vector<8x128xf32>, vector<128x128xf32>, vector<8x128xf32> -> vector<8x128xf32>
    %10 = arith.addf %8, %9 : vector<8x128xf32>
    %11 = math.tanh %10 : vector<8x128xf32>
    %12 = vector.extract_strided_slice %5 {offsets = [8, 0], sizes = [8, 128], strides = [1, 1]} : vector<64x128xf32> to vector<8x128xf32>
    %cst_10 = arith.constant dense<0.000000e+00> : vector<8x128xf32>
    %13 = tpu.matmul %11, %6, %cst_10 {dimension_numbers = #tpu.dot_dimension_numbers<[1], [0], [0], [1], [0, 0, 1, 1], [], []>} : vector<8x128xf32>, vector<128x128xf32>, vector<8x128xf32> -> vector<8x128xf32>
    %14 = arith.addf %12, %13 : vector<8x128xf32>
    %15 = math.tanh %14 : vector<8x128xf32>
    %16 = vector.extract_strided_slice %5 {offsets = [16, 0], sizes = [8, 128], strides = [1, 1]} : vector<64x128xf32> to vector<8x128xf32>
    %cst_11 = arith.constant dense<0.000000e+00> : vector<8x128xf32>
    %17 = tpu.matmul %15, %6, %cst_11 {dimension_numbers = #tpu.dot_dimension_numbers<[1], [0], [0], [1], [0, 0, 1, 1], [], []>} : vector<8x128xf32>, vector<128x128xf32>, vector<8x128xf32> -> vector<8x128xf32>
    %18 = arith.addf %16, %17 : vector<8x128xf32>
    %19 = math.tanh %18 : vector<8x128xf32>
    %20 = vector.extract_strided_slice %5 {offsets = [24, 0], sizes = [8, 128], strides = [1, 1]} : vector<64x128xf32> to vector<8x128xf32>
    %cst_12 = arith.constant dense<0.000000e+00> : vector<8x128xf32>
    %21 = tpu.matmul %19, %6, %cst_12 {dimension_numbers = #tpu.dot_dimension_numbers<[1], [0], [0], [1], [0, 0, 1, 1], [], []>} : vector<8x128xf32>, vector<128x128xf32>, vector<8x128xf32> -> vector<8x128xf32>
    %22 = arith.addf %20, %21 : vector<8x128xf32>
    %23 = math.tanh %22 : vector<8x128xf32>
    %24 = vector.extract_strided_slice %5 {offsets = [32, 0], sizes = [8, 128], strides = [1, 1]} : vector<64x128xf32> to vector<8x128xf32>
    %cst_13 = arith.constant dense<0.000000e+00> : vector<8x128xf32>
    %25 = tpu.matmul %23, %6, %cst_13 {dimension_numbers = #tpu.dot_dimension_numbers<[1], [0], [0], [1], [0, 0, 1, 1], [], []>} : vector<8x128xf32>, vector<128x128xf32>, vector<8x128xf32> -> vector<8x128xf32>
    %26 = arith.addf %24, %25 : vector<8x128xf32>
    %27 = math.tanh %26 : vector<8x128xf32>
    %28 = vector.extract_strided_slice %5 {offsets = [40, 0], sizes = [8, 128], strides = [1, 1]} : vector<64x128xf32> to vector<8x128xf32>
    %cst_14 = arith.constant dense<0.000000e+00> : vector<8x128xf32>
    %29 = tpu.matmul %27, %6, %cst_14 {dimension_numbers = #tpu.dot_dimension_numbers<[1], [0], [0], [1], [0, 0, 1, 1], [], []>} : vector<8x128xf32>, vector<128x128xf32>, vector<8x128xf32> -> vector<8x128xf32>
    %30 = arith.addf %28, %29 : vector<8x128xf32>
    %31 = math.tanh %30 : vector<8x128xf32>
    %32 = vector.extract_strided_slice %5 {offsets = [48, 0], sizes = [8, 128], strides = [1, 1]} : vector<64x128xf32> to vector<8x128xf32>
    %cst_15 = arith.constant dense<0.000000e+00> : vector<8x128xf32>
    %33 = tpu.matmul %31, %6, %cst_15 {dimension_numbers = #tpu.dot_dimension_numbers<[1], [0], [0], [1], [0, 0, 1, 1], [], []>} : vector<8x128xf32>, vector<128x128xf32>, vector<8x128xf32> -> vector<8x128xf32>
    %34 = arith.addf %32, %33 : vector<8x128xf32>
    %35 = math.tanh %34 : vector<8x128xf32>
    %36 = vector.extract_strided_slice %5 {offsets = [56, 0], sizes = [8, 128], strides = [1, 1]} : vector<64x128xf32> to vector<8x128xf32>
    %cst_16 = arith.constant dense<0.000000e+00> : vector<8x128xf32>
    %37 = tpu.matmul %35, %6, %cst_16 {dimension_numbers = #tpu.dot_dimension_numbers<[1], [0], [0], [1], [0, 0, 1, 1], [], []>} : vector<8x128xf32>, vector<128x128xf32>, vector<8x128xf32> -> vector<8x128xf32>
    %38 = arith.addf %36, %37 : vector<8x128xf32>
    %39 = math.tanh %38 : vector<8x128xf32>
    %40 = tpu.concatenate %11, %15, %19, %23, %27, %31, %35, %39 in 0 : vector<8x128xf32>, vector<8x128xf32>, vector<8x128xf32>, vector<8x128xf32>, vector<8x128xf32>, vector<8x128xf32>, vector<8x128xf32>, vector<8x128xf32> -> vector<64x128xf32>
    %41 = arith.truncf %40 : vector<64x128xf32> to vector<64x128xbf16>
    %c0_17 = arith.constant 0 : index
    %c0_18 = arith.constant 0 : index
    %42 = vector.load %arg5[%c0_17, %c0_18] : memref<128x128xbf16, #tpu.memory_space<vmem>>, vector<128x128xbf16>
    %cst_19 = arith.constant dense<0.000000e+00> : vector<64x128xf32>
    %43 = tpu.matmul %41, %42, %cst_19 {dimension_numbers = #tpu.dot_dimension_numbers<[1], [0], [0], [1], [0, 0, 1, 1], [], []>} : vector<64x128xbf16>, vector<128x128xbf16>, vector<64x128xf32> -> vector<64x128xf32>
    %c0_20 = arith.constant 0 : index
    %c0_21 = arith.constant 0 : index
    %44 = vector.load %arg6[%c0_20, %c0_21] : memref<1x128xf32, #tpu.memory_space<vmem>>, vector<1x128xf32>
    %45 = vector.broadcast %44 : vector<1x128xf32> to vector<64x128xf32>
    %46 = arith.addf %43, %45 : vector<64x128xf32>
    %c0_22 = arith.constant 0 : index
    %c0_23 = arith.constant 0 : index
    %47 = vector.load %arg7[%c0_22, %c0_23] : memref<64x128xf32, #tpu.memory_space<vmem>>, vector<64x128xf32>
    tpu.vector_store %arg7[%c0_22, %c0_23], %46 {strides = array<i32>} : memref<64x128xf32, #tpu.memory_space<vmem>>, vector<64x128xf32>,
    %c0_24 = arith.constant 0 : index
    %c0_25 = arith.constant 0 : index
    %48 = vector.load %arg8[%c0_24, %c0_25] : memref<8x128xf32, #tpu.memory_space<vmem>>, vector<8x128xf32>
    tpu.vector_store %arg8[%c0_24, %c0_25], %39 {strides = array<i32>} : memref<8x128xf32, #tpu.memory_space<vmem>>, vector<8x128xf32>,
    return
  }
}

</mosaic_0001>

<bundles_post_ra>
// kernel: tpu_custom_call.1
= control target key start
LH: loop header
LB: loop body
LE: loop exit
PB: predicated region body
PF: predicated region fallthrough
CT: control target
= control target key end

     0   :  { %14 = vsyncpa [#allocation3], 0  ;;  %s2192_s0 = inlined_call_operand.hbm [shape: bf16[64,128], index: 0, kind: input, shape index: {}]   ;;  %s2193_s1 = inlined_call_operand.hbm [shape: f32[8,128], index: 1, kind: input, shape index: {}]   ;;  %s2194_s2 = inlined_call_operand.hbm [shape: bf16[128,128], index: 2, kind: input, shape index: {}]   ;;  %s2195_s3 = inlined_call_operand.hbm [shape: f32[128,128], index: 3, kind: input, shape index: {}]   ;;  %s2196_s4 = inlined_call_operand.vmem [shape: f32[1,128], index: 4, kind: input, shape index: {}]   ;;  %s2197_s5 = inlined_call_operand.hbm [shape: bf16[128,128], index: 5, kind: input, shape index: {}]   ;;  %s2198_s6 = inlined_call_operand.vmem [shape: f32[1,128], index: 6, kind: input, shape index: {}]   ;;  %s2199_s7 = inlined_call_operand.hbm [shape: f32[64,128], index: 7, kind: output, shape index: {0}]   ;;  %s2200_s8 = inlined_call_operand.hbm [shape: f32[8,128], index: 8, kind: output, shape index: {1}]  }
   0x1   :  { %15 = vsyncpa [#allocation6], 0 }
   0x2   :  { %16 = vsyncpa [#allocation9], 0 }
   0x3   :  { %17 = vsyncpa [#allocation4], 0 }
   0x4   :  { %18 = vsyncpa [#allocation13], 0  ;;  %s1749_s27 = smov [#allocation5]   ;;  %s1750_s29 = smov [#allocation8]  }
   0x5   :  { %s37_s28 = sshll.u32 %s1749_s27, 4  ;;  %s58_s30 = sshll.u32 %s1750_s29, 4  ;;  %s38_s28 = int_to_ptr.vmem [resolvable:$true] %s37_s28  ;;  %s59_s30 = int_to_ptr.vmem [resolvable:$true] %s58_s30 }
   0x6   :  { %s1607_s9 = scalar_lea.vmem %s38_s28, 128  ;;  %p1612_p1 = scmp.lt.s32.totalorder %s38_s28, %s38_s28 }
   0x7   :  { %p1608_p0 = scmp.ne.s32.totalorder %s38_s28, %s1607_s9  ;;  %p1613_p2 = scmp.lt.s32.totalorder %s1607_s9, %s1607_s9 }
   0x9   :  { %p1614_p3 = por %p1613_p2, %p1612_p1 }
   0xb   :  { %p1615_p4 = pnand %p1614_p3, %p1608_p0 }
   0xd   :  { %1618 = shalt.err (!%p1615_p4)
}
   0xe   :  { %40 = dma.hbm_to_vmem [thread:$0]  %s2193_s1, 128, %s38_s28, [#allocation6]  }
   0xf   :  { %s1627_s12 = scalar_lea.vmem %s59_s30, 2048  ;;  %p1632_p6 = scmp.lt.s32.totalorder %s59_s30, %s59_s30 }
  0x10   :  { %p1628_p5 = scmp.ne.s32.totalorder %s59_s30, %s1627_s12  ;;  %p1633_p7 = scmp.lt.s32.totalorder %s1627_s12, %s1627_s12 }
  0x12   :  { %p1634_p8 = por %p1633_p7, %p1632_p6 }
  0x14   :  { %p1635_p9 = pnand %p1634_p8, %p1628_p5 }
  0x16   :  { %1638 = shalt.err (!%p1635_p9)
}
  0x17   :  { %s1751_s13 = smov 128   ;;  %s1752_s14 = smov 8  }
  0x18   :  { %64 = dma.hbm_to_vmem [thread:$0]  %s2195_s3, 2048, %s59_s30, [#allocation9], %s1751_s13, %s1751_s13, %s1752_s14  }
  0x19   :  { %s1753_s17 = smov [#allocation2]  }
  0x1a   :  { %s24_s18 = sshll.u32 %s1753_s17, 4  ;;  %s25_s18 = int_to_ptr.vmem [resolvable:$true] %s24_s18 }
  0x1b   :  { %s1647_s1 = scalar_lea.vmem %s25_s18, 512  ;;  %p1652_p11 = scmp.lt.s32.totalorder %s25_s18, %s25_s18 }
  0x1c   :  { %p1648_p10 = scmp.ne.s32.totalorder %s25_s18, %s1647_s1  ;;  %p1653_p12 = scmp.lt.s32.totalorder %s1647_s1, %s1647_s1 }
  0x1e   :  { %p1654_p13 = por %p1653_p12, %p1652_p11 }
  0x20   :  { %p1655_p0 = pnand %p1654_p13, %p1648_p10 }
  0x22   :  { %1658 = shalt.err (!%p1655_p0)
}
  0x23   :  { %s1754_s19 = smov 64   ;;  %s1755_s20 = smov 4  }
  0x24   :  { %30 = dma.hbm_to_vmem [thread:$0]  %s2192_s0, 512, %s25_s18, [#allocation3], %s1754_s19, %s1754_s19, %s1755_s20  }
  0x25   :  { %s1756_s23 = smov [#allocation7]   ;;  %s1757_s3 = smov [#allocation10]  }
  0x26   :  { %s46_s24 = sshll.u32 %s1756_s23, 4  ;;  %s72_s25 = sshll.u32 %s1757_s3, 4  ;;  %s47_s24 = int_to_ptr.vmem [resolvable:$true] %s46_s24  ;;  %s73_s25 = int_to_ptr.vmem [resolvable:$true] %s72_s25 }
  0x27   :  { %s1667_s26 = scalar_lea.vmem %s47_s24, 1024  ;;  %p1672_p2 = scmp.lt.s32.totalorder %s47_s24, %s47_s24 }
  0x28   :  { %p1668_p1 = scmp.ne.s32.totalorder %s47_s24, %s1667_s26  ;;  %p1673_p3 = scmp.lt.s32.totalorder %s1667_s26, %s1667_s26 }
  0x2a   :  { %p1674_p4 = por %p1673_p3, %p1672_p2 }
  0x2c   :  { %p1675_p5 = pnand %p1674_p4, %p1668_p1 }
  0x2e   :  { %1678 = shalt.err (!%p1675_p5)
}
  0x2f   :  { %52 = dma.hbm_to_vmem [thread:$0]  %s2194_s2, 1024, %s47_s24, [#allocation6], %s1754_s19, %s1754_s19, %s1755_s20  }
  0x30   :  { %s1687_s29 = scalar_lea.vmem %s73_s25, 1024  ;;  %p1692_p7 = scmp.lt.s32.totalorder %s73_s25, %s73_s25 }
  0x31   :  { %p1688_p6 = scmp.ne.s32.totalorder %s73_s25, %s1687_s29  ;;  %p1693_p8 = scmp.lt.s32.totalorder %s1687_s29, %s1687_s29 }
  0x33   :  { %p1694_p9 = por %p1693_p8, %p1692_p7 }
  0x35   :  { %p1695_p10 = pnand %p1694_p9, %p1688_p6 }
  0x37   :  { %1698 = shalt.err (!%p1695_p10)
}
  0x38   :  { %78 = dma.hbm_to_vmem [thread:$0]  %s2197_s5, 1024, %s73_s25, [#allocation9], %s1754_s19, %s1754_s19, %s1755_s20  }
  0x39   :  { %1739 = dma.done.wait [#allocation3], 512  }
  0x3a   :  { %1740 = vsyncadd [#allocation3], 4294966784 }
  0x3b   :  { %1741 = dma.done.wait [#allocation6], 1152  }
  0x3c   :  { %1742 = vsyncadd [#allocation6], 4294966144 }
  0x3d   :  { %1743 = dma.done.wait [#allocation9], 3072  }
  0x3e   :  { %1744 = vsyncadd [#allocation9], 4294964224  ;;  %v1758_v0 = vmov 0.0   ;;  %vm1759_vm0 = vmmov 0   ;;  %v1563_v1 = vld [vmem:[#allocation7 + $0x38] sm:$0xff]   ;;  %v1564_v3 = vld [vmem:[#allocation7 + $0x30] sm:$0xff]  }
  0x3f   :  { %1246 = vmatprep.subr.mxu1 %v1758_v0  ;;  %1278 = vmatprep.mubr.msk.f32.mxu1 %vm1759_vm0, %v1758_v0  ;;  %v1828_v2 = vld [vmem:[#allocation8 + $0x78] sm:$0xff]  ;;  %v1831_v4 = vld [vmem:[#allocation8 + $0x70] sm:$0xff]  ;;  %v1834_v5 = vld [vmem:[#allocation8 + $0x68] sm:$0xff] }
  0x40   :  { %1222 = vmatprep.subr.bf16.mxu0 %v1563_v1  ;;  %1247 = vmatpush3.msra.mxu1 %v1828_v2  ;;  %v1565_v6 = vld [vmem:[#allocation7 + $0x28] sm:$0xff]   ;;  %v1838_v7 = vld [vmem:[#allocation8 + $0x60] sm:$0xff]  ;;  %v1842_v8 = vld [vmem:[#allocation8 + $0x58] sm:$0xff] }
  0x41   :  { %1223 = vmatpush3.bf16.msra.mxu0 %v1563_v1  ;;  %1248 = vmatprep.subr.mxu1 %v1758_v0  ;;  %v1566_v9 = vld [vmem:[#allocation7 + $0x20] sm:$0xff]   ;;  %v1846_v10 = vld [vmem:[#allocation8 + $0x50] sm:$0xff]  ;;  %v1850_v11 = vld [vmem:[#allocation8 + $0x48] sm:$0xff] }
  0x42   :  { %1224 = vmatprep.subr.bf16.mxu0 %v1564_v3  ;;  %1249 = vmatpush3.msra.mxu1 %v1831_v4  ;;  %v1567_v12 = vld [vmem:[#allocation7 + $0x18] sm:$0xff]   ;;  %v1854_v13 = vld [vmem:[#allocation8 + $0x40] sm:$0xff]  ;;  %v1568_v16 = vld [vmem:[#allocation7 + $0x10] sm:$0xff]  }
  0x43   :  { %1250 = vmatprep.subr.mxu1 %v1758_v0  ;;  %v1571_v14 = vld [vmem:[#allocation2] sm:$0xff]   ;;  %v1860_v17 = vld [vmem:[#allocation8 + $0x30] sm:$0xff]  ;;  %v1864_v18 = vld [vmem:[#allocation8 + $0x28] sm:$0xff] }
  0x44   :  { %1251 = vmatpush3.msra.mxu1 %v1834_v5  ;;  %v1857_v15 = vld [vmem:[#allocation8 + $0x38] sm:$0xff]  ;;  %1238 = vmatprep.mubr.bf16.mxu0 %v1571_v14  ;;  %v1569_v19 = vld [vmem:[#allocation7 + $0x8] sm:$0xff]   ;;  %v1868_v20 = vld [vmem:[#allocation8 + $0x20] sm:$0xff] }
  0x45   :  { %1225 = vmatpush3.bf16.msra.mxu0 %v1564_v3  ;;  %1252 = vmatprep.subr.mxu1 %v1758_v0  ;;  %v1874_v21 = vld [vmem:[#allocation8 + $0x18] sm:$0xff]  ;;  %v1570_v22 = vld [vmem:[#allocation7] sm:$0xff]   ;;  %v1878_v23 = vld [vmem:[#allocation8 + $0x10] sm:$0xff] }
  0x46   :  { %1226 = vmatprep.subr.bf16.mxu0 %v1565_v6  ;;  %1253 = vmatpush3.msra.mxu1 %v1838_v7  ;;  %v1882_v24 = vld [vmem:[#allocation8 + $0x8] sm:$0xff]  ;;  %v1886_v25 = vld [vmem:[#allocation8] sm:$0xff]  ;;  %v281_v27 = vld [vmem:[#allocation5] sm:$0xff] }
  0x47   :  { %1254 = vmatprep.subr.mxu1 %v1758_v0  ;;  %v1572_v26 = vld [vmem:[#allocation2 + $0x8] sm:$0xff]   ;;  %v1573_v28 = vld [vmem:[#allocation2 + $0x10] sm:$0xff]   ;;  %v1574_v29 = vld [vmem:[#allocation2 + $0x18] sm:$0xff]  }
  0x48   :  { %1255 = vmatpush3.msra.mxu1 %v1842_v8  ;;  %v1966_v33 = vld [vmem:[%s2196_s4] ss:$0 sm:$0xff] }
  0x49   :  { %1227 = vmatpush3.bf16.msra.mxu0 %v1565_v6  ;;  %1256 = vmatprep.subr.mxu1 %v1758_v0  ;;  %v1575_v1 = vld [vmem:[#allocation10 + $0x38] sm:$0xff]   ;;  %v1576_v6 = vld [vmem:[#allocation10 + $0x30] sm:$0xff]  }
  0x4a   :  { %1228 = vmatprep.subr.bf16.mxu0 %v1566_v9  ;;  %1257 = vmatpush3.msra.mxu1 %v1846_v10 }
  0x4b   :  { %1258 = vmatprep.subr.mxu1 %v1758_v0 }
  0x4c   :  { %1259 = vmatpush3.msra.mxu1 %v1850_v11 }
  0x4d   :  { %1229 = vmatpush3.bf16.msra.mxu0 %v1566_v9  ;;  %1260 = vmatprep.subr.mxu1 %v1758_v0  ;;  %v1578_v9 = vld [vmem:[#allocation10 + $0x20] sm:$0xff]  }
  0x4e   :  { %1230 = vmatprep.subr.bf16.mxu0 %v1567_v12  ;;  %1261 = vmatpush3.msra.mxu1 %v1854_v13 }
  0x4f   :  { %1262 = vmatprep.subr.mxu1 %v1758_v0 }
  0x50   :  { %1263 = vmatpush3.msra.mxu1 %v1857_v15 }
  0x51   :  { %1231 = vmatpush3.bf16.msra.mxu0 %v1567_v12  ;;  %1264 = vmatprep.subr.mxu1 %v1758_v0  ;;  %v1581_v12 = vld [vmem:[#allocation10 + $0x8] sm:$0xff]  }
  0x52   :  { %1232 = vmatprep.subr.bf16.mxu0 %v1568_v16  ;;  %1265 = vmatpush3.msra.mxu1 %v1860_v17 }
  0x53   :  { %1266 = vmatprep.subr.mxu1 %v1758_v0 }
  0x54   :  { %1267 = vmatpush3.msra.mxu1 %v1864_v18 }
  0x55   :  { %1233 = vmatpush3.bf16.msra.mxu0 %v1568_v16  ;;  %1268 = vmatprep.subr.mxu1 %v1758_v0 }
  0x56   :  { %1234 = vmatprep.subr.bf16.mxu0 %v1569_v19  ;;  %1269 = vmatpush3.msra.mxu1 %v1868_v20 }
  0x57   :  { %1270 = vmatprep.subr.mxu1 %v1758_v0 }
  0x58   :  { %1271 = vmatpush3.msra.mxu1 %v1874_v21 }
  0x59   :  { %1235 = vmatpush3.bf16.msra.mxu0 %v1569_v19  ;;  %1272 = vmatprep.subr.mxu1 %v1758_v0 }
  0x5a   :  { %1236 = vmatprep.subr.bf16.mxu0 %v1570_v22  ;;  %1273 = vmatpush3.msra.mxu1 %v1878_v23 }
  0x5b   :  { %1274 = vmatprep.subr.mxu1 %v1758_v0 }
  0x5c   :  { %1275 = vmatpush3.msra.mxu1 %v1882_v24 }
  0x5d   :  { %1237 = vmatpush3.bf16.msra.mxu0 %v1570_v22  ;;  %1276 = vmatprep.subr.mxu1 %v1758_v0 }
  0x5e   :  { %1277 = vmatpush3.msra.mxu1 %v1886_v25  ;;  %1281 = vmatprep.subr.mxu0 %v1758_v0 }
  0x5f   :  { %1279 = vmatmul.mubr.f32.vlgmr.msra.gmra.mxu1 %v281_v27  ;;  %1316 = vmatprep.subr.mxu1 %v1758_v0 }
  0x60   :  { %1239 = vmatmul.mubr.bf16.vlgmr.msra.gmra.mxu0 %v1572_v26  ;;  %1317 = vmatpush3.msra.mxu1 %v1828_v2 }
  0x61   :  { %1282 = vmatpush3.msra.mxu0 %v1828_v2  ;;  %1318 = vmatprep.subr.mxu1 %v1758_v0 }
  0x62   :  { %1283 = vmatprep.subr.mxu0 %v1758_v0  ;;  %1319 = vmatpush3.msra.mxu1 %v1831_v4 }
  0x63   :  { %1284 = vmatpush3.msra.mxu0 %v1831_v4  ;;  %1320 = vmatprep.subr.mxu1 %v1758_v0 }
  0x64   :  { %1285 = vmatprep.subr.mxu0 %v1758_v0  ;;  %1321 = vmatpush3.msra.mxu1 %v1834_v5 }
  0x65   :  { %1286 = vmatpush3.msra.mxu0 %v1834_v5  ;;  %1322 = vmatprep.subr.mxu1 %v1758_v0 }
  0x66   :  { %1287 = vmatprep.subr.mxu0 %v1758_v0  ;;  %1323 = vmatpush3.msra.mxu1 %v1838_v7 }
  0x67   :  { %1288 = vmatpush3.msra.mxu0 %v1838_v7  ;;  %1324 = vmatprep.subr.mxu1 %v1758_v0 }
  0x68   :  { %1289 = vmatprep.subr.mxu0 %v1758_v0  ;;  %1325 = vmatpush3.msra.mxu1 %v1842_v8 }
  0x69   :  { %1290 = vmatpush3.msra.mxu0 %v1842_v8  ;;  %1326 = vmatprep.subr.mxu1 %v1758_v0 }
  0x6a   :  { %1291 = vmatprep.subr.mxu0 %v1758_v0  ;;  %1327 = vmatpush3.msra.mxu1 %v1846_v10 }
  0x6b   :  { %1292 = vmatpush3.msra.mxu0 %v1846_v10  ;;  %1328 = vmatprep.subr.mxu1 %v1758_v0 }
  0x6c   :  { %1293 = vmatprep.subr.mxu0 %v1758_v0  ;;  %1329 = vmatpush3.msra.mxu1 %v1850_v11 }
  0x6d   :  { %1294 = vmatpush3.msra.mxu0 %v1850_v11  ;;  %1330 = vmatprep.subr.mxu1 %v1758_v0 }
  0x6e   :  { %1295 = vmatprep.subr.mxu0 %v1758_v0  ;;  %1331 = vmatpush3.msra.mxu1 %v1854_v13 }
  0x6f   :  { %1296 = vmatpush3.msra.mxu0 %v1854_v13  ;;  %1332 = vmatprep.subr.mxu1 %v1758_v0 }
  0x70   :  { %1297 = vmatprep.subr.mxu0 %v1758_v0  ;;  %1333 = vmatpush3.msra.mxu1 %v1857_v15 }
  0x71   :  { %1298 = vmatpush3.msra.mxu0 %v1857_v15  ;;  %1334 = vmatprep.subr.mxu1 %v1758_v0 }
  0x72   :  { %1299 = vmatprep.subr.mxu0 %v1758_v0  ;;  %1335 = vmatpush3.msra.mxu1 %v1860_v17 }
  0x73   :  { %1300 = vmatpush3.msra.mxu0 %v1860_v17  ;;  %1336 = vmatprep.subr.mxu1 %v1758_v0 }
  0x74   :  { %1301 = vmatprep.subr.mxu0 %v1758_v0  ;;  %1337 = vmatpush3.msra.mxu1 %v1864_v18 }
  0x75   :  { %1302 = vmatpush3.msra.mxu0 %v1864_v18  ;;  %1338 = vmatprep.subr.mxu1 %v1758_v0 }
  0x76   :  { %1303 = vmatprep.subr.mxu0 %v1758_v0  ;;  %1339 = vmatpush3.msra.mxu1 %v1868_v20 }
  0x77   :  { %1304 = vmatpush3.msra.mxu0 %v1868_v20  ;;  %1340 = vmatprep.subr.mxu1 %v1758_v0 }
  0x78   :  { %1305 = vmatprep.subr.mxu0 %v1758_v0  ;;  %1341 = vmatpush3.msra.mxu1 %v1874_v21 }
  0x79   :  { %1306 = vmatpush3.msra.mxu0 %v1874_v21  ;;  %1342 = vmatprep.subr.mxu1 %v1758_v0 }
  0x7a   :  { %1307 = vmatprep.subr.mxu0 %v1758_v0  ;;  %1343 = vmatpush3.msra.mxu1 %v1878_v23 }
  0x7b   :  { %1308 = vmatpush3.msra.mxu0 %v1878_v23  ;;  %1344 = vmatprep.subr.mxu1 %v1758_v0 }
  0x7c   :  { %1309 = vmatprep.subr.mxu0 %v1758_v0  ;;  %1345 = vmatpush3.msra.mxu1 %v1882_v24 }
  0x7d   :  { %1310 = vmatpush3.msra.mxu0 %v1882_v24  ;;  %1346 = vmatprep.subr.mxu1 %v1758_v0 }
  0x7e   :  { %1311 = vmatprep.subr.mxu0 %v1758_v0  ;;  %1347 = vmatpush3.msra.mxu1 %v1886_v25 }
  0x7f   :  { %1312 = vmatpush3.msra.mxu0 %v1886_v25  ;;  %1348 = vmatprep.mubr.msk.f32.mxu1 %vm1759_vm0, %v1758_v0 }
  0x80   :  { %1351 = vmatprep.subr.mxu0 %v1758_v0  ;;  %1386 = vmatprep.subr.mxu1 %v1758_v0 }
  0x81   :  { %1242 = vmatprep.mubr.bf16.mxu0 %v1573_v28 }
  0x82   :  { %1243 = vmatmul.mubr.bf16.gmra.mxu0 %v1574_v29 }
  0x83   :  { %1313 = vmatprep.mubr.msk.f32.mxu0 %vm1759_vm0, %v1758_v0 }
 0x11f   :  { %v348_v30 = vpop.f32.mrf.mxu1 }
 0x120   :  { %v1961_v31 = vpop.f32.mrf.mxu0 }
 0x121   :  { %v1280_v32 = vpop.f32.mrf.mxu1  ;;  %v243_v49 = vadd.f32 %v1961_v31, %v1966_v33 }
 0x122   :  { %v234_v34 = vpop.f32.mrf.mxu0 }
 0x123   :  { %v235_v35 = vadd.f32 %v1966_v33, %v234_v34 }
 0x124   :  { %v2006_v38 = vpop.f32.mrf.mxu0 }
 0x125   :  { %v352_v36 = vadd.f32 %v348_v30, %v235_v35  ;;  %v246_v54 = vadd.f32 %v2006_v38, %v1966_v33 }
 0x126   :  { %v237_v39 = vpop.f32.mrf.mxu0 }
 0x127   :  { %1583 = vtanh.f32 %v352_v36  ;;  %v238_v44 = vadd.f32 %v1966_v33, %v237_v39 }
 0x134   :  { %v1969_v37 = vpop.eup %1583 }
 0x135   :  { %1314 = vmatmul.mubr.f32.vlgmr.msra.gmra.mxu0 %v1969_v37 }
 0x136   :  { %1352 = vmatpush3.msra.mxu0 %v1828_v2  ;;  %1383 = vmatprep.mubr.msk.f32.mxu0 %vm1759_vm0, %v1758_v0 }
 0x137   :  { %1353 = vmatprep.subr.mxu0 %v1758_v0 }
 0x138   :  { %1354 = vmatpush3.msra.mxu0 %v1831_v4 }
 0x139   :  { %1355 = vmatprep.subr.mxu0 %v1758_v0 }
 0x13a   :  { %1356 = vmatpush3.msra.mxu0 %v1834_v5 }
 0x13b   :  { %1357 = vmatprep.subr.mxu0 %v1758_v0 }
 0x13c   :  { %1358 = vmatpush3.msra.mxu0 %v1838_v7 }
 0x13d   :  { %1359 = vmatprep.subr.mxu0 %v1758_v0 }
 0x13e   :  { %1360 = vmatpush3.msra.mxu0 %v1842_v8 }
 0x13f   :  { %1361 = vmatprep.subr.mxu0 %v1758_v0 }
 0x140   :  { %1362 = vmatpush3.msra.mxu0 %v1846_v10 }
 0x141   :  { %1363 = vmatprep.subr.mxu0 %v1758_v0 }
 0x142   :  { %1364 = vmatpush3.msra.mxu0 %v1850_v11  ;;  %v2008_v40 = vpop.f32.mrf.mxu0 }
 0x143   :  { %1365 = vmatprep.subr.mxu0 %v1758_v0  ;;  %v259_v16 = vadd.f32 %v2008_v40, %v1966_v33 }
 0x144   :  { %1366 = vmatpush3.msra.mxu0 %v1854_v13  ;;  %v2010_v41 = vpop.f32.mrf.mxu0 }
 0x145   :  { %1367 = vmatprep.subr.mxu0 %v1758_v0  ;;  %v251_v59 = vadd.f32 %v1966_v33, %v2010_v41 }
 0x146   :  { %1368 = vmatpush3.msra.mxu0 %v1857_v15  ;;  %v2012_v42 = vpop.f32.mrf.mxu0 }
 0x147   :  { %1369 = vmatprep.subr.mxu0 %v1758_v0  ;;  %v262_v30 = vadd.f32 %v2012_v42, %v1966_v33 }
 0x148   :  { %1370 = vmatpush3.msra.mxu0 %v1860_v17  ;;  %v2014_v43 = vpop.f32.mrf.mxu0 }
 0x149   :  { %1371 = vmatprep.subr.mxu0 %v1758_v0 }
 0x14a   :  { %1372 = vmatpush3.msra.mxu0 %v1864_v18 }
 0x14b   :  { %1373 = vmatprep.subr.mxu0 %v1758_v0 }
 0x14c   :  { %1374 = vmatpush3.msra.mxu0 %v1868_v20 }
 0x14d   :  { %1375 = vmatprep.subr.mxu0 %v1758_v0 }
 0x14e   :  { %1376 = vmatpush3.msra.mxu0 %v1874_v21 }
 0x14f   :  { %1377 = vmatprep.subr.mxu0 %v1758_v0 }
 0x150   :  { %1378 = vmatpush3.msra.mxu0 %v1878_v23 }
 0x151   :  { %1379 = vmatprep.subr.mxu0 %v1758_v0 }
 0x152   :  { %1380 = vmatpush3.msra.mxu0 %v1882_v24 }
 0x153   :  { %1381 = vmatprep.subr.mxu0 %v1758_v0 }
 0x154   :  { %1382 = vmatpush3.msra.mxu0 %v1886_v25 }
 0x155   :  { %1421 = vmatprep.subr.mxu0 %v1758_v0 }
 0x1f5   :  { %v420_v45 = vpop.f32.mrf.mxu0 }
 0x1f6   :  { %v424_v46 = vadd.f32 %v420_v45, %v238_v44 }
 0x1f7   :  { %v1315_v47 = vpop.f32.mrf.mxu0 }
 0x1f8   :  { %1585 = vtanh.f32 %v424_v46 }
 0x205   :  { %v2017_v48 = vpop.eup %1585 }
 0x206   :  { %1349 = vmatmul.mubr.f32.vlgmr.msra.gmra.mxu1 %v2017_v48 }
 0x207   :  { %1387 = vmatpush3.msra.mxu1 %v1828_v2  ;;  %1418 = vmatprep.mubr.msk.f32.mxu1 %vm1759_vm0, %v1758_v0 }
 0x208   :  { %1388 = vmatprep.subr.mxu1 %v1758_v0 }
 0x209   :  { %1389 = vmatpush3.msra.mxu1 %v1831_v4 }
 0x20a   :  { %1390 = vmatprep.subr.mxu1 %v1758_v0 }
 0x20b   :  { %1391 = vmatpush3.msra.mxu1 %v1834_v5 }
 0x20c   :  { %1392 = vmatprep.subr.mxu1 %v1758_v0 }
 0x20d   :  { %1393 = vmatpush3.msra.mxu1 %v1838_v7 }
 0x20e   :  { %1394 = vmatprep.subr.mxu1 %v1758_v0 }
 0x20f   :  { %1395 = vmatpush3.msra.mxu1 %v1842_v8 }
 0x210   :  { %1396 = vmatprep.subr.mxu1 %v1758_v0 }
 0x211   :  { %1397 = vmatpush3.msra.mxu1 %v1846_v10 }
 0x212   :  { %1398 = vmatprep.subr.mxu1 %v1758_v0 }
 0x213   :  { %1399 = vmatpush3.msra.mxu1 %v1850_v11 }
 0x214   :  { %1400 = vmatprep.subr.mxu1 %v1758_v0 }
 0x215   :  { %1401 = vmatpush3.msra.mxu1 %v1854_v13 }
 0x216   :  { %1402 = vmatprep.subr.mxu1 %v1758_v0 }
 0x217   :  { %1403 = vmatpush3.msra.mxu1 %v1857_v15 }
 0x218   :  { %1404 = vmatprep.subr.mxu1 %v1758_v0 }
 0x219   :  { %1405 = vmatpush3.msra.mxu1 %v1860_v17 }
 0x21a   :  { %1406 = vmatprep.subr.mxu1 %v1758_v0 }
 0x21b   :  { %1407 = vmatpush3.msra.mxu1 %v1864_v18 }
 0x21c   :  { %1408 = vmatprep.subr.mxu1 %v1758_v0 }
 0x21d   :  { %1409 = vmatpush3.msra.mxu1 %v1868_v20 }
 0x21e   :  { %1410 = vmatprep.subr.mxu1 %v1758_v0 }
 0x21f   :  { %1411 = vmatpush3.msra.mxu1 %v1874_v21 }
 0x220   :  { %1412 = vmatprep.subr.mxu1 %v1758_v0 }
 0x221   :  { %1413 = vmatpush3.msra.mxu1 %v1878_v23 }
 0x222   :  { %1414 = vmatprep.subr.mxu1 %v1758_v0 }
 0x223   :  { %1415 = vmatpush3.msra.mxu1 %v1882_v24 }
 0x224   :  { %1416 = vmatprep.subr.mxu1 %v1758_v0 }
 0x225   :  { %1417 = vmatpush3.msra.mxu1 %v1886_v25 }
 0x226   :  { %1456 = vmatprep.subr.mxu1 %v1758_v0 }
 0x2c6   :  { %v492_v50 = vpop.f32.mrf.mxu1 }
 0x2c7   :  { %v496_v51 = vadd.f32 %v492_v50, %v243_v49 }
 0x2c8   :  { %v1350_v52 = vpop.f32.mrf.mxu1 }
 0x2c9   :  { %1587 = vtanh.f32 %v496_v51 }
 0x2d6   :  { %v2056_v53 = vpop.eup %1587 }
 0x2d7   :  { %1384 = vmatmul.mubr.f32.vlgmr.msra.gmra.mxu0 %v2056_v53 }
 0x2d8   :  { %1422 = vmatpush3.msra.mxu0 %v1828_v2  ;;  %1453 = vmatprep.mubr.msk.f32.mxu0 %vm1759_vm0, %v1758_v0 }
 0x2d9   :  { %1423 = vmatprep.subr.mxu0 %v1758_v0 }
 0x2da   :  { %1424 = vmatpush3.msra.mxu0 %v1831_v4 }
 0x2db   :  { %1425 = vmatprep.subr.mxu0 %v1758_v0 }
 0x2dc   :  { %1426 = vmatpush3.msra.mxu0 %v1834_v5 }
 0x2dd   :  { %1427 = vmatprep.subr.mxu0 %v1758_v0 }
 0x2de   :  { %1428 = vmatpush3.msra.mxu0 %v1838_v7 }
 0x2df   :  { %1429 = vmatprep.subr.mxu0 %v1758_v0 }
 0x2e0   :  { %1430 = vmatpush3.msra.mxu0 %v1842_v8 }
 0x2e1   :  { %1431 = vmatprep.subr.mxu0 %v1758_v0 }
 0x2e2   :  { %1432 = vmatpush3.msra.mxu0 %v1846_v10 }
 0x2e3   :  { %1433 = vmatprep.subr.mxu0 %v1758_v0 }
 0x2e4   :  { %1434 = vmatpush3.msra.mxu0 %v1850_v11 }
 0x2e5   :  { %1435 = vmatprep.subr.mxu0 %v1758_v0 }
 0x2e6   :  { %1436 = vmatpush3.msra.mxu0 %v1854_v13 }
 0x2e7   :  { %1437 = vmatprep.subr.mxu0 %v1758_v0 }
 0x2e8   :  { %1438 = vmatpush3.msra.mxu0 %v1857_v15 }
 0x2e9   :  { %1439 = vmatprep.subr.mxu0 %v1758_v0 }
 0x2ea   :  { %1440 = vmatpush3.msra.mxu0 %v1860_v17 }
 0x2eb   :  { %1441 = vmatprep.subr.mxu0 %v1758_v0 }
 0x2ec   :  { %1442 = vmatpush3.msra.mxu0 %v1864_v18 }
 0x2ed   :  { %1443 = vmatprep.subr.mxu0 %v1758_v0 }
 0x2ee   :  { %1444 = vmatpush3.msra.mxu0 %v1868_v20 }
 0x2ef   :  { %1445 = vmatprep.subr.mxu0 %v1758_v0 }
 0x2f0   :  { %1446 = vmatpush3.msra.mxu0 %v1874_v21 }
 0x2f1   :  { %1447 = vmatprep.subr.mxu0 %v1758_v0 }
 0x2f2   :  { %1448 = vmatpush3.msra.mxu0 %v1878_v23 }
 0x2f3   :  { %1449 = vmatprep.subr.mxu0 %v1758_v0 }
 0x2f4   :  { %1450 = vmatpush3.msra.mxu0 %v1882_v24 }
 0x2f5   :  { %1451 = vmatprep.subr.mxu0 %v1758_v0 }
 0x2f6   :  { %1452 = vmatpush3.msra.mxu0 %v1886_v25 }
 0x2f7   :  { %1491 = vmatprep.subr.mxu0 %v1758_v0 }
 0x397   :  { %v564_v55 = vpop.f32.mrf.mxu0 }
 0x398   :  { %v568_v56 = vadd.f32 %v564_v55, %v246_v54 }
 0x399   :  { %v1385_v57 = vpop.f32.mrf.mxu0 }
 0x39a   :  { %1589 = vtanh.f32 %v568_v56 }
 0x3a7   :  { %v2095_v58 = vpop.eup %1589 }
 0x3a8   :  { %1419 = vmatmul.mubr.f32.vlgmr.msra.gmra.mxu1 %v2095_v58  ;;  %v859_v14 = vpack.c.bf16 %v2095_v58, %v2056_v53 }
 0x3a9   :  { %1457 = vmatpush3.msra.mxu1 %v1828_v2  ;;  %1488 = vmatprep.mubr.msk.f32.mxu1 %vm1759_vm0, %v1758_v0 }
 0x3aa   :  { %1458 = vmatprep.subr.mxu1 %v1758_v0 }
 0x3ab   :  { %1459 = vmatpush3.msra.mxu1 %v1831_v4 }
 0x3ac   :  { %1460 = vmatprep.subr.mxu1 %v1758_v0 }
 0x3ad   :  { %1461 = vmatpush3.msra.mxu1 %v1834_v5 }
 0x3ae   :  { %1462 = vmatprep.subr.mxu1 %v1758_v0 }
 0x3af   :  { %1463 = vmatpush3.msra.mxu1 %v1838_v7 }
 0x3b0   :  { %1464 = vmatprep.subr.mxu1 %v1758_v0 }
 0x3b1   :  { %1465 = vmatpush3.msra.mxu1 %v1842_v8 }
 0x3b2   :  { %1466 = vmatprep.subr.mxu1 %v1758_v0 }
 0x3b3   :  { %1467 = vmatpush3.msra.mxu1 %v1846_v10 }
 0x3b4   :  { %1468 = vmatprep.subr.mxu1 %v1758_v0 }
 0x3b5   :  { %1469 = vmatpush3.msra.mxu1 %v1850_v11 }
 0x3b6   :  { %1470 = vmatprep.subr.mxu1 %v1758_v0 }
 0x3b7   :  { %1471 = vmatpush3.msra.mxu1 %v1854_v13 }
 0x3b8   :  { %1472 = vmatprep.subr.mxu1 %v1758_v0 }
 0x3b9   :  { %1473 = vmatpush3.msra.mxu1 %v1857_v15 }
 0x3ba   :  { %1474 = vmatprep.subr.mxu1 %v1758_v0 }
 0x3bb   :  { %1475 = vmatpush3.msra.mxu1 %v1860_v17 }
 0x3bc   :  { %1476 = vmatprep.subr.mxu1 %v1758_v0 }
 0x3bd   :  { %1477 = vmatpush3.msra.mxu1 %v1864_v18 }
 0x3be   :  { %1478 = vmatprep.subr.mxu1 %v1758_v0 }
 0x3bf   :  { %1479 = vmatpush3.msra.mxu1 %v1868_v20 }
 0x3c0   :  { %1480 = vmatprep.subr.mxu1 %v1758_v0 }
 0x3c1   :  { %1481 = vmatpush3.msra.mxu1 %v1874_v21 }
 0x3c2   :  { %1482 = vmatprep.subr.mxu1 %v1758_v0 }
 0x3c3   :  { %1483 = vmatpush3.msra.mxu1 %v1878_v23 }
 0x3c4   :  { %1484 = vmatprep.subr.mxu1 %v1758_v0 }
 0x3c5   :  { %1485 = vmatpush3.msra.mxu1 %v1882_v24 }
 0x3c6   :  { %1486 = vmatprep.subr.mxu1 %v1758_v0 }
 0x3c7   :  { %1487 = vmatpush3.msra.mxu1 %v1886_v25 }
 0x3c8   :  { %1526 = vmatprep.subr.bf16.mxu1 %v1575_v1 }
 0x468   :  { %v636_v60 = vpop.f32.mrf.mxu1 }
 0x469   :  { %v640_v61 = vadd.f32 %v636_v60, %v251_v59 }
 0x46a   :  { %v1420_v62 = vpop.f32.mrf.mxu1 }
 0x46b   :  { %1591 = vtanh.f32 %v640_v61 }
 0x478   :  { %v2133_v63 = vpop.eup %1591 }
 0x479   :  { %1454 = vmatmul.mubr.f32.vlgmr.msra.gmra.mxu0 %v2133_v63 }
 0x47a   :  { %1492 = vmatpush3.msra.mxu0 %v1828_v2  ;;  %1523 = vmatprep.mubr.msk.f32.mxu0 %vm1759_vm0, %v1758_v0  ;;  %v254_v2 = vadd.f32 %v1966_v33, %v2014_v43 }
 0x47b   :  { %1493 = vmatprep.subr.mxu0 %v1758_v0 }
 0x47c   :  { %1494 = vmatpush3.msra.mxu0 %v1831_v4 }
 0x47d   :  { %1495 = vmatprep.subr.mxu0 %v1758_v0 }
 0x47e   :  { %1496 = vmatpush3.msra.mxu0 %v1834_v5 }
 0x47f   :  { %1497 = vmatprep.subr.mxu0 %v1758_v0 }
 0x480   :  { %1498 = vmatpush3.msra.mxu0 %v1838_v7 }
 0x481   :  { %1499 = vmatprep.subr.mxu0 %v1758_v0 }
 0x482   :  { %1500 = vmatpush3.msra.mxu0 %v1842_v8  ;;  %v858_v8 = vpack.c.bf16 %v2017_v48, %v1969_v37 }
 0x483   :  { %1501 = vmatprep.subr.mxu0 %v1758_v0 }
 0x484   :  { %1502 = vmatpush3.msra.mxu0 %v1846_v10  ;;  %v1579_v10 = vld [vmem:[#allocation10 + $0x18] sm:$0xff]  }
 0x485   :  { %1503 = vmatprep.subr.mxu0 %v1758_v0 }
 0x486   :  { %1504 = vmatpush3.msra.mxu0 %v1850_v11  ;;  %v1580_v11 = vld [vmem:[#allocation10 + $0x10] sm:$0xff]  }
 0x487   :  { %1505 = vmatprep.subr.mxu0 %v1758_v0 }
 0x488   :  { %1506 = vmatpush3.msra.mxu0 %v1854_v13  ;;  %v1582_v13 = vld [vmem:[#allocation10] sm:$0xff]  }
 0x489   :  { %1507 = vmatprep.subr.mxu0 %v1758_v0 }
 0x48a   :  { %1508 = vmatpush3.msra.mxu0 %v1857_v15 }
 0x48b   :  { %1509 = vmatprep.subr.mxu0 %v1758_v0 }
 0x48c   :  { %1510 = vmatpush3.msra.mxu0 %v1860_v17 }
 0x48d   :  { %1511 = vmatprep.subr.mxu0 %v1758_v0 }
 0x48e   :  { %1512 = vmatpush3.msra.mxu0 %v1864_v18 }
 0x48f   :  { %1513 = vmatprep.subr.mxu0 %v1758_v0 }
 0x490   :  { %1514 = vmatpush3.msra.mxu0 %v1868_v20 }
 0x491   :  { %1515 = vmatprep.subr.mxu0 %v1758_v0 }
 0x492   :  { %1516 = vmatpush3.msra.mxu0 %v1874_v21  ;;  %v1053_v21 = vld [vmem:[%s2198_s6] ss:$0 sm:$0xff]  ;;  %s1760_s6 = smov [#allocation12]  }
 0x493   :  { %1517 = vmatprep.subr.mxu0 %v1758_v0  ;;  %s1025_s10 = sshll.u32 %s1760_s6, 4  ;;  %s1026_s10 = int_to_ptr.vmem [resolvable:$true] %s1025_s10 }
 0x494   :  { %1518 = vmatpush3.msra.mxu0 %v1878_v23  ;;  %s1699_s11 = scalar_lea.vmem %s1026_s10, 128  ;;  %p1704_p12 = scmp.lt.s32.totalorder %s1026_s10, %s1026_s10 }
 0x495   :  { %1519 = vmatprep.subr.mxu0 %v1758_v0  ;;  %p1700_p11 = scmp.ne.s32.totalorder %s1026_s10, %s1699_s11  ;;  %p1705_p13 = scmp.lt.s32.totalorder %s1699_s11, %s1699_s11 }
 0x496   :  { %1520 = vmatpush3.msra.mxu0 %v1882_v24 }
 0x497   :  { %1521 = vmatprep.subr.mxu0 %v1758_v0  ;;  %v1577_v0 = vld [vmem:[#allocation10 + $0x28] sm:$0xff]   ;;  %p1706_p0 = por %p1705_p13, %p1704_p12 }
 0x498   :  { %1522 = vmatpush3.msra.mxu0 %v1886_v25 }
 0x499   :  { %p1707_p1 = pnand %p1706_p0, %p1700_p11 }
 0x539   :  { %v708_v3 = vpop.f32.mrf.mxu0 }
 0x53a   :  { %v712_v4 = vadd.f32 %v708_v3, %v254_v2 }
 0x53b   :  { %v1455_v5 = vpop.f32.mrf.mxu0 }
 0x53c   :  { %1593 = vtanh.f32 %v712_v4 }
 0x549   :  { %v1594_v7 = vpop.eup %1593 }
 0x54a   :  { %1489 = vmatmul.mubr.f32.vlgmr.msra.gmra.mxu1 %v1594_v7  ;;  %v860_v15 = vpack.c.bf16 %v1594_v7, %v2133_v63 }
 0x54b   :  { %1527 = vmatpush3.bf16.msra.mxu1 %v1575_v1  ;;  %1542 = vmatprep.mubr.bf16.mxu1 %v858_v8 }
 0x54c   :  { %1528 = vmatprep.subr.bf16.mxu1 %v1576_v6 }
 0x54f   :  { %1529 = vmatpush3.bf16.msra.mxu1 %v1576_v6 }
 0x550   :  { %1530 = vmatprep.subr.bf16.mxu1 %v1577_v0 }
 0x553   :  { %1531 = vmatpush3.bf16.msra.mxu1 %v1577_v0 }
 0x554   :  { %1532 = vmatprep.subr.bf16.mxu1 %v1578_v9 }
 0x557   :  { %1533 = vmatpush3.bf16.msra.mxu1 %v1578_v9 }
 0x558   :  { %1534 = vmatprep.subr.bf16.mxu1 %v1579_v10 }
 0x55b   :  { %1535 = vmatpush3.bf16.msra.mxu1 %v1579_v10 }
 0x55c   :  { %1536 = vmatprep.subr.bf16.mxu1 %v1580_v11 }
 0x55f   :  { %1537 = vmatpush3.bf16.msra.mxu1 %v1580_v11 }
 0x560   :  { %1538 = vmatprep.subr.bf16.mxu1 %v1581_v12 }
 0x563   :  { %1539 = vmatpush3.bf16.msra.mxu1 %v1581_v12 }
 0x564   :  { %1540 = vmatprep.subr.bf16.mxu1 %v1582_v13 }
 0x567   :  { %1541 = vmatpush3.bf16.msra.mxu1 %v1582_v13 }
 0x56a   :  { %1543 = vmatmul.mubr.bf16.vlgmr.msra.gmra.mxu1 %v859_v14 }
 0x56b   :  { %1546 = vmatprep.mubr.bf16.mxu1 %v860_v15 }
 0x60a   :  { %v780_v17 = vpop.f32.mrf.mxu1 }
 0x60b   :  { %v784_v18 = vadd.f32 %v780_v17, %v259_v16 }
 0x60c   :  { %v1490_v19 = vpop.f32.mrf.mxu1 }
 0x60d   :  { %1595 = vtanh.f32 %v784_v18 }
 0x61a   :  { %v1596_v20 = vpop.eup %1595 }
 0x61b   :  { %1524 = vmatmul.mubr.f32.vlgmr.msra.gmra.mxu0 %v1596_v20 }
 0x62a   :  { %v1544_v22 = vpop.f32.mrf.mxu1 }
 0x62b   :  { %v976_v23 = vadd.f32 %v1544_v22, %v1053_v21 }
 0x62c   :  { %v967_v24 = vpop.f32.mrf.mxu1 }
 0x62d   :  { %1000 = vst [vmem:[#allocation11 + $0x10] sm:$0xff] %v976_v23  ;;  %v968_v25 = vadd.f32 %v1053_v21, %v967_v24 }
 0x62e   :  { %v1545_v26 = vpop.f32.mrf.mxu1 }
 0x62f   :  { %998 = vst [vmem:[#allocation11] sm:$0xff] %v968_v25  ;;  %v979_v27 = vadd.f32 %v1545_v26, %v1053_v21 }
 0x630   :  { %v970_v28 = vpop.f32.mrf.mxu1 }
 0x631   :  { %1001 = vst [vmem:[#allocation11 + $0x18] sm:$0xff] %v979_v27  ;;  %v971_v29 = vadd.f32 %v1053_v21, %v970_v28 }
 0x633   :  { %999 = vst [vmem:[#allocation11 + $0x8] sm:$0xff] %v971_v29 }
 0x6db   :  { %v852_v31 = vpop.f32.mrf.mxu0 }
 0x6dc   :  { %v856_v32 = vadd.f32 %v852_v31, %v262_v30 }
 0x6dd   :  { %v1525_v34 = vpop.f32.mrf.mxu0 }
 0x6de   :  { %1597 = vtanh.f32 %v856_v32 }
 0x6eb   :  { %v1598_v35 = vpop.eup %1597 }
 0x6ec   :  { %1006 = vst [vmem:[#allocation12] sm:$0xff] %v1598_v35  ;;  %v861_v36 = vpack.c.bf16 %v1598_v35, %v1596_v20 }
 0x6ee   :  { %1547 = vmatmul.mubr.bf16.gmra.mxu1 %v861_v36 }
 0x6ef   :  { %1710 = shalt.err (!%p1707_p1)
}
 0x6f0   :  { %1028 = dma.vmem_to_hbm [thread:$0]  %s1026_s10, 128, %s2200_s8, [#allocation13]  }
 0x6f1   :  { %s1761_s16 = smov [#allocation11]  }
 0x6f2   :  { %s1012_s17 = sshll.u32 %s1761_s16, 4  ;;  %s1013_s17 = int_to_ptr.vmem [resolvable:$true] %s1012_s17 }
 0x6f3   :  { %s1719_s18 = scalar_lea.vmem %s1013_s17, 1024  ;;  %p1724_p3 = scmp.lt.s32.totalorder %s1013_s17, %s1013_s17 }
 0x6f4   :  { %p1720_p2 = scmp.ne.s32.totalorder %s1013_s17, %s1719_s18  ;;  %p1725_p4 = scmp.lt.s32.totalorder %s1719_s18, %s1719_s18 }
 0x6f6   :  { %p1726_p5 = por %p1725_p4, %p1724_p3 }
 0x6f8   :  { %p1727_p6 = pnand %p1726_p5, %p1720_p2 }
 0x7ae   :  { %v1548_v33 = vpop.f32.mrf.mxu1 }
 0x7af   :  { %v992_v37 = vadd.f32 %v1548_v33, %v1053_v21 }
 0x7b0   :  { %v983_v38 = vpop.f32.mrf.mxu1 }
 0x7b1   :  { %1004 = vst [vmem:[#allocation11 + $0x30] sm:$0xff] %v992_v37  ;;  %v984_v39 = vadd.f32 %v1053_v21, %v983_v38 }
 0x7b2   :  { %v1549_v40 = vpop.f32.mrf.mxu1 }
 0x7b3   :  { %1002 = vst [vmem:[#allocation11 + $0x20] sm:$0xff] %v984_v39  ;;  %v995_v41 = vadd.f32 %v1549_v40, %v1053_v21 }
 0x7b4   :  { %v986_v42 = vpop.f32.mrf.mxu1 }
 0x7b5   :  { %1005 = vst [vmem:[#allocation11 + $0x38] sm:$0xff] %v995_v41  ;;  %v987_v43 = vadd.f32 %v1053_v21, %v986_v42 }
 0x7b7   :  { %1003 = vst [vmem:[#allocation11 + $0x28] sm:$0xff] %v987_v43 }
 0x7b8   :  { %1730 = shalt.err (!%p1727_p6)
}
 0x7b9   :  { %1018 = dma.vmem_to_hbm [thread:$0]  %s1013_s17, 1024, %s2199_s7, [#allocation4], %s1751_s13, %s1751_s13, %s1752_s14  }
 0x7ba   :  { %1745 = dma.done.wait [#allocation4], 1024  }
 0x7bb   :  { %1746 = vsyncadd [#allocation4], 4294966272 }
 0x7bc   :  { %1747 = dma.done.wait [#allocation13], 128  }
 0x7bd   :  { %1748 = vsyncadd [#allocation13], 4294967168 }
 0x7be   :  { %1035 = vsyncpa [#allocation3], 1 }
 0x7bf   :  { %1036 = vsyncpa [#allocation6], 1 }
 0x7c0   :  { %1037 = vsyncpa [#allocation9], 1 }
 0x7c1   :  { %1038 = vsyncpa [#allocation4], 1 }
 0x7c2   :  { %1039 = vsyncpa [#allocation13], 1 }

</bundles_post_ra>
